<compile_context>
chip_gen: v6e
topology: v6e:2x2x1
jax: 0.10.0
libtpu: 0.0.40
codegen_flags: <defaults>
</compile_context>

<pallas_src>
import functools
import math

import jax
import jax.numpy as jnp
from jax.experimental import pallas as pl
from jax.experimental.pallas import tpu as pltpu


def _round_up(x, m):
    return pl.cdiv(x, m) * m


def _chip_config():
    """Generation-aware defaults: (vmem budget, target tiles, #TCs hint)."""
    kind = ""
    try:
        kind = jax.devices()[0].device_kind.lower()
    except Exception:
        pass
    if "v7" in kind:
        # 64 MiB physical VMEM, 2 TensorCores/chip, fast HBM.
        return dict(vmem_limit=48 * 1024 * 1024, tm=256, tf=512, multi_tc=True)
    if "v6" in kind:
        # 128 MiB physical VMEM, 1 TC.
        return dict(vmem_limit=96 * 1024 * 1024, tm=512, tf=1024, multi_tc=False)
    if "v5" in kind:
        # 128 MiB physical VMEM, weaker MXU -> prioritize big tf.
        return dict(vmem_limit=96 * 1024 * 1024, tm=256, tf=1024, multi_tc=False)
    # Unknown generation: conservative.
    return dict(vmem_limit=64 * 1024 * 1024, tm=256, tf=512, multi_tc=False)


def _vmem_estimate(tm, tf, dp):
    """Rough double-buffered VMEM footprint of the kernel in bytes."""
    x_b = 2 * tm * dp * 4                 # f32 input row tile
    o_b = 2 * tm * dp * 4                 # f32 output row tile
    w_b = 2 * (dp * tf + tf * dp) * 2     # bf16 W1^T / W2^T tiles
    bias = 2 * (8 * tf + 8 * dp) * 4      # padded bias rows
    return x_b + o_b + w_b + bias


# ---------------------------------------------------------------------------
# Fused FFN kernel: one (row-tile, d_ff-tile) step per grid point.
#   x_ref   : (tm, Dp)   f32    row tile of the input (resident across f axis)
#   w1t_ref : (Dp, tf)   bf16   W1^T column tile
#   b1_ref  : (1,  tf)   f32    b1 tile
#   w2t_ref : (tf, Dp)   bf16   W2^T row tile
#   b2_ref  : (1,  Dp)   f32    full b2
#   o_ref   : (tm, Dp)   f32    output row tile == accumulator (resident)
# ---------------------------------------------------------------------------
def _ffn_kernel(x_ref, w1t_ref, b1_ref, w2t_ref, b2_ref, o_ref):
    f = pl.program_id(1)

    @pl.when(f == 0)
    def _init():
        # Fold the b2 bias into the accumulator init (no finalize pass needed).
        o_ref[...] = jnp.broadcast_to(b2_ref[...], o_ref.shape).astype(o_ref.dtype)

    # hidden tile: relu(x @ W1^T[:, f] + b1[f])   -- f32 accumulation / epilogue
    x = x_ref[...].astype(jnp.bfloat16)
    h = jnp.dot(x, w1t_ref[...], preferred_element_type=jnp.float32)
    h = jnp.maximum(h + b1_ref[...], 0.0)

    # TODO(synk): dropout on h skipped (identity in eval mode).

    # accumulate second matmul directly into the resident output block
    o_ref[...] += jnp.dot(
        h.astype(w2t_ref.dtype), w2t_ref[...], preferred_element_type=jnp.float32
    )


def _ffn_forward(x, w1t_p, b1_p, w2t_p, b2_p, *, tm, tf, multi_tc, vmem_limit):
    """x: (..., d_model) f32 -> (..., d_model) f32.  Padded/packed params."""
    orig_shape = x.shape
    d_model = orig_shape[-1]
    M = 1
    for s in orig_shape[:-1]:
        M *= s

    Dp = w1t_p.shape[0]           # padded d_model (multiple of 128)
    Fp = w1t_p.shape[1]           # padded d_ff    (multiple of tf)

    # Row tile: at most `tm`, padded to a multiple of 8 sublanes.
    tm_eff = min(tm, _round_up(M, 8))
    # On 2-TC chips, guarantee >=2 row tiles so both cores get work.
    if multi_tc and M > 8 and pl.cdiv(M, tm_eff) < 2:
        tm_eff = _round_up(pl.cdiv(M, 2), 8)
    Mp = tm_eff * pl.cdiv(M, tm_eff)

    x2 = x.reshape(M, d_model)
    needs_pad = (Mp != M) or (Dp != d_model)
    if needs_pad:
        x2 = jnp.pad(x2, ((0, Mp - M), (0, Dp - d_model)))

    grid = (Mp // tm_eff, Fp // tf)

    out = pl.pallas_call(
        _ffn_kernel,
        out_shape=jax.ShapeDtypeStruct((Mp, Dp), jnp.float32),
        grid_spec=pltpu.PrefetchScalarGridSpec(
            num_scalar_prefetch=0,
            grid=grid,
            in_specs=[
                pl.BlockSpec((tm_eff, Dp), lambda i, f: (i, 0)),   # x row tile
                pl.BlockSpec((Dp, tf), lambda i, f: (0, f)),       # W1^T cols
                pl.BlockSpec((1, tf), lambda i, f: (0, f)),        # b1 tile
                pl.BlockSpec((tf, Dp), lambda i, f: (f, 0)),       # W2^T rows
                pl.BlockSpec((1, Dp), lambda i, f: (0, 0)),        # b2
            ],
            out_specs=pl.BlockSpec((tm_eff, Dp), lambda i, f: (i, 0)),
        ),
        compiler_params=pltpu.CompilerParams(
            dimension_semantics=("parallel", "arbitrary"),
            vmem_limit_bytes=vmem_limit,
        ),
    )(x2, w1t_p, b1_p, w2t_p, b2_p)

    if needs_pad:
        out = out[:M, :d_model]
    return out.reshape(orig_shape)


# ---------------------------------------------------------------------------
# Module wrapper (deterministic synthetic parameters, torch-style init)
# ---------------------------------------------------------------------------
class PositionwiseFeedForwardPallas:
    def __init__(self, d_model, d_ff, key, dropout=0.1):
        self.d_model = d_model
        self.d_ff = d_ff

        # nn.Linear default init: U(-1/sqrt(fan_in), +1/sqrt(fan_in))
        k1, k2, k3, k4 = jax.random.split(key, 4)
        bound1 = 1.0 / math.sqrt(d_model)
        bound2 = 1.0 / math.sqrt(d_ff)
        self.w1 = jax.random.uniform(k1, (d_ff, d_model), jnp.float32, -bound1, bound1)
        self.b1 = jax.random.uniform(k2, (d_ff,), jnp.float32, -bound1, bound1)
        self.w2 = jax.random.uniform(k3, (d_model, d_ff), jnp.float32, -bound2, bound2)
        self.b2 = jax.random.uniform(k4, (d_model,), jnp.float32, -bound2, bound2)

        # --- Generation-aware tiling / VMEM budget -------------------------
        cfg = _chip_config()
        Dp = _round_up(d_model, 128)
        Fp_full = _round_up(d_ff, 128)
        budget = int(cfg["vmem_limit"] * 0.9)     # headroom

        tm = cfg["tm"]
        tf = None
        # Prefer the full d_ff in one tile (weights resident, no re-streaming,
        # reduction grid collapses to 1); otherwise shrink tf, then tm.
        for cand in (Fp_full, cfg["tf"], 1024, 512, 256, 128):
            if cand > Fp_full or cand % 128 != 0:
                continue
            if _vmem_estimate(tm, cand, Dp) <= budget:
                tf = cand
                break
        while tf is None and tm > 8:
            tm = max(8, tm // 2)
            if _vmem_estimate(tm, 128, Dp) <= budget:
                tf = 128
        if tf is None:
            tm, tf = 8, 128   # last resort

        self.tm = tm
        self.tf = tf
        Fp = _round_up(d_ff, tf)

        # One-time layout prep: transpose, pad to (8,128)-friendly shapes, cast
        # matmul operands to bf16 (biases stay f32 for the f32 epilogue).
        self.w1t_p = jnp.pad(
            self.w1.T, ((0, Dp - d_model), (0, Fp - d_ff))
        ).astype(jnp.bfloat16)                                        # (Dp, Fp)
        self.b1_p = jnp.pad(self.b1, (0, Fp - d_ff)).reshape(1, Fp)   # (1, Fp) f32
        self.w2t_p = jnp.pad(
            self.w2.T, ((0, Fp - d_ff), (0, Dp - d_model))
        ).astype(jnp.bfloat16)                                        # (Fp, Dp)
        self.b2_p = jnp.pad(self.b2, (0, Dp - d_model)).reshape(1, Dp)  # (1, Dp) f32

        self._fwd = jax.jit(
            functools.partial(
                _ffn_forward,
                tm=self.tm,
                tf=self.tf,
                multi_tc=cfg["multi_tc"],
                vmem_limit=cfg["vmem_limit"],
            )
        )

    def __call__(self, x):
        return self._fwd(x, self.w1t_p, self.b1_p, self.w2t_p, self.b2_p)


# ---------------------------------------------------------------------------
# Pure-JAX f32 reference (mirrors the PyTorch forward, dropout=identity)
# ---------------------------------------------------------------------------
def reference_ffn(x, w1, b1, w2, b2):
    h = jnp.maximum(x @ w1.T + b1, 0.0)
    return h @ w2.T + b2


if __name__ == "__main__":
    B, S, d_model, d_ff = 2, 8, 32, 64

    root = jax.random.PRNGKey(0)
    k_params, k_x = jax.random.split(root)

    ffn = PositionwiseFeedForwardPallas(d_model, d_ff, k_params)
    x = jax.random.normal(k_x, (B, S, d_model), jnp.float32)

    out = ffn(x)
    out = jax.block_until_ready(out)

    ref = reference_ffn(x, ffn.w1, ffn.b1, ffn.w2, ffn.b2)
    assert out.shape == (B, S, d_model)
    max_err = float(jnp.max(jnp.abs(out - ref)))
    # bf16 matmul inputs with f32 accumulation -> small quantization error
    assert max_err < 5e-2, f"mismatch vs reference: max abs err = {max_err}"

    print("KERNEL_OK")
</pallas_src>

<mosaic_0001>
module attributes {stable_mosaic.version = 11 : i64} {
  func.func @_ffn_kernel(%arg0: i32, %arg1: i32, %arg2: memref<16x128xf32, #tpu.memory_space<vmem>>, %arg3: memref<128x128xbf16, #tpu.memory_space<vmem>>, %arg4: memref<1x128xf32, #tpu.memory_space<vmem>>, %arg5: memref<128x128xbf16, #tpu.memory_space<vmem>>, %arg6: memref<1x128xf32, #tpu.memory_space<vmem>>, %arg7: memref<16x128xf32, #tpu.memory_space<vmem>>) attributes {dimension_semantics = [#tpu.dimension_semantics<parallel>, #tpu.dimension_semantics<arbitrary>], iteration_bounds = array<i64: 1, 1>, scalar_prefetch = 0 : i64, scratch_operands = 0 : i64, tpu.core_type = #tpu.core_type<tc>, window_params = [{transform_indices = @transform_0, window_bounds = array<i64: 16, 128>}, {transform_indices = @transform_1, window_bounds = array<i64: 128, 128>}, {transform_indices = @transform_2, window_bounds = array<i64: 1, 128>}, {transform_indices = @transform_3, window_bounds = array<i64: 128, 128>}, {pipeline_mode = #tpu.pipeline_mode<synchronous>, transform_indices = @transform_4, window_bounds = array<i64: 1, 128>}, {transform_indices = @transform_5, window_bounds = array<i64: 16, 128>}]} {
    %c0_i32 = arith.constant 0 : i32
    %0 = arith.cmpi eq, %arg1, %c0_i32 : i32
    %1 = arith.extui %0 : i1 to i32
    %c0_i32_0 = arith.constant 0 : i32
    %2 = arith.cmpi ne, %1, %c0_i32_0 : i32
    scf.if %2 {
      %c0_14 = arith.constant 0 : index
      %c0_15 = arith.constant 0 : index
      %18 = vector.load %arg6[%c0_14, %c0_15] : memref<1x128xf32, #tpu.memory_space<vmem>>, vector<1x128xf32>
      %19 = vector.shape_cast %18 : vector<1x128xf32> to vector<1x128xf32>
      %20 = vector.broadcast %19 : vector<1x128xf32> to vector<16x128xf32>
      %c0_16 = arith.constant 0 : index
      %c0_17 = arith.constant 0 : index
      %21 = vector.load %arg7[%c0_16, %c0_17] : memref<16x128xf32, #tpu.memory_space<vmem>>, vector<16x128xf32>
      tpu.vector_store %arg7[%c0_16, %c0_17], %20 {strides = array<i32>} : memref<16x128xf32, #tpu.memory_space<vmem>>, vector<16x128xf32>,
    } else {
    }
    %c0 = arith.constant 0 : index
    %c0_1 = arith.constant 0 : index
    %3 = vector.load %arg2[%c0, %c0_1] : memref<16x128xf32, #tpu.memory_space<vmem>>, vector<16x128xf32>
    %4 = arith.truncf %3 : vector<16x128xf32> to vector<16x128xbf16>
    %c0_2 = arith.constant 0 : index
    %c0_3 = arith.constant 0 : index
    %5 = vector.load %arg3[%c0_2, %c0_3] : memref<128x128xbf16, #tpu.memory_space<vmem>>, vector<128x128xbf16>
    %cst = arith.constant dense<0.000000e+00> : vector<16x128xf32>
    %6 = tpu.matmul %4, %5, %cst {dimension_numbers = #tpu.dot_dimension_numbers<[1], [0], [0], [1], [0, 0, 1, 1], [], []>} : vector<16x128xbf16>, vector<128x128xbf16>, vector<16x128xf32> -> vector<16x128xf32>
    %c0_4 = arith.constant 0 : index
    %c0_5 = arith.constant 0 : index
    %7 = vector.load %arg4[%c0_4, %c0_5] : memref<1x128xf32, #tpu.memory_space<vmem>>, vector<1x128xf32>
    %8 = vector.broadcast %7 : vector<1x128xf32> to vector<16x128xf32>
    %9 = arith.addf %6, %8 : vector<16x128xf32>
    %cst_6 = arith.constant 0.000000e+00 : f32
    %10 = vector.broadcast %cst_6 : f32 to vector<16x128xf32>
    %11 = arith.maximumf %9, %10 : vector<16x128xf32>
    %c0_7 = arith.constant 0 : index
    %c0_8 = arith.constant 0 : index
    %12 = vector.load %arg7[%c0_7, %c0_8] : memref<16x128xf32, #tpu.memory_space<vmem>>, vector<16x128xf32>
    %13 = arith.truncf %11 : vector<16x128xf32> to vector<16x128xbf16>
    %c0_9 = arith.constant 0 : index
    %c0_10 = arith.constant 0 : index
    %14 = vector.load %arg5[%c0_9, %c0_10] : memref<128x128xbf16, #tpu.memory_space<vmem>>, vector<128x128xbf16>
    %cst_11 = arith.constant dense<0.000000e+00> : vector<16x128xf32>
    %15 = tpu.matmul %13, %14, %cst_11 {dimension_numbers = #tpu.dot_dimension_numbers<[1], [0], [0], [1], [0, 0, 1, 1], [], []>} : vector<16x128xbf16>, vector<128x128xbf16>, vector<16x128xf32> -> vector<16x128xf32>
    %16 = arith.addf %12, %15 : vector<16x128xf32>
    %c0_12 = arith.constant 0 : index
    %c0_13 = arith.constant 0 : index
    %17 = vector.load %arg7[%c0_12, %c0_13] : memref<16x128xf32, #tpu.memory_space<vmem>>, vector<16x128xf32>
    tpu.vector_store %arg7[%c0_12, %c0_13], %16 {strides = array<i32>} : memref<16x128xf32, #tpu.memory_space<vmem>>, vector<16x128xf32>,
    return
  }
  func.func @transform_0(%arg0: i32, %arg1: i32) -> (i32, i32) {
    %c0_i32 = arith.constant 0 : i32
    %c0_i32_0 = arith.constant 0 : i32
    return %arg0, %c0_i32 : i32, i32
  }
  func.func @transform_1(%arg0: i32, %arg1: i32) -> (i32, i32) {
    %c0_i32 = arith.constant 0 : i32
    %c0_i32_0 = arith.constant 0 : i32
    return %c0_i32, %arg1 : i32, i32
  }
  func.func @transform_2(%arg0: i32, %arg1: i32) -> (i32, i32) {
    %c0_i32 = arith.constant 0 : i32
    %c0_i32_0 = arith.constant 0 : i32
    return %c0_i32, %arg1 : i32, i32
  }
  func.func @transform_3(%arg0: i32, %arg1: i32) -> (i32, i32) {
    %c0_i32 = arith.constant 0 : i32
    %c0_i32_0 = arith.constant 0 : i32
    return %arg1, %c0_i32 : i32, i32
  }
  func.func @transform_4(%arg0: i32, %arg1: i32) -> (i32, i32) {
    %c0_i32 = arith.constant 0 : i32
    %c0_i32_0 = arith.constant 0 : i32
    %c0_i32_1 = arith.constant 0 : i32
    return %c0_i32, %c0_i32_0 : i32, i32
  }
  func.func @transform_5(%arg0: i32, %arg1: i32) -> (i32, i32) {
    %c0_i32 = arith.constant 0 : i32
    %c0_i32_0 = arith.constant 0 : i32
    return %arg0, %c0_i32 : i32, i32
  }
}

</mosaic_0001>

<bundles_post_ra>
// kernel: _ffn_forward.1
= control target key start
LH: loop header
LB: loop body
LE: loop exit
PB: predicated region body
PF: predicated region fallthrough
CT: control target
= control target key end

     0   :  { %10 = vsyncpa [#allocation3], 0  ;;  %s499_s0 = inlined_call_operand.vmem [shape: f32[16,128], index: 0, kind: input, shape index: {}]   ;;  %s500_s1 = inlined_call_operand.hbm [shape: bf16[128,128], index: 1, kind: input, shape index: {}]   ;;  %s501_s2 = inlined_call_operand.vmem [shape: f32[1,128], index: 2, kind: input, shape index: {}]   ;;  %s502_s3 = inlined_call_operand.hbm [shape: bf16[128,128], index: 3, kind: input, shape index: {}]   ;;  %s503_s4 = inlined_call_operand.vmem [shape: f32[1,128], index: 4, kind: input, shape index: {}]   ;;  %s504_s5 = inlined_call_operand.vmem [shape: f32[16,128], index: 5, kind: output, shape index: {}]  }
   0x1   :  { %11 = vsyncpa [#allocation5], 0  ;;  %s439_s18 = smov [#allocation2]  }
   0x2   :  { %s19_s19 = sshll.u32 %s439_s18, 4  ;;  %s20_s19 = int_to_ptr.vmem [resolvable:$true] %s19_s19 }
   0x3   :  { %s403_s20 = scalar_lea.vmem %s20_s19, 1024  ;;  %p408_p1 = scmp.lt.s32.totalorder %s20_s19, %s20_s19 }
   0x4   :  { %p404_p0 = scmp.ne.s32.totalorder %s20_s19, %s403_s20  ;;  %p409_p2 = scmp.lt.s32.totalorder %s403_s20, %s403_s20 }
   0x6   :  { %p410_p3 = por %p409_p2, %p408_p1 }
   0x8   :  { %p411_p4 = pnand %p410_p3, %p404_p0 }
   0xa   :  { %414 = shalt.err (!%p411_p4)
}
   0xb   :  { %s440_s21 = smov 64   ;;  %s441_s22 = smov 4  }
   0xc   :  { %25 = dma.hbm_to_vmem [thread:$0]  %s500_s1, 1024, %s20_s19, [#allocation3], %s440_s21, %s440_s21, %s441_s22  }
   0xd   :  { %s442_s25 = smov [#allocation4]  }
   0xe   :  { %s33_s26 = sshll.u32 %s442_s25, 4  ;;  %s34_s26 = int_to_ptr.vmem [resolvable:$true] %s33_s26 }
   0xf   :  { %s423_s27 = scalar_lea.vmem %s34_s26, 1024  ;;  %p428_p6 = scmp.lt.s32.totalorder %s34_s26, %s34_s26 }
  0x10   :  { %p424_p5 = scmp.ne.s32.totalorder %s34_s26, %s423_s27  ;;  %p429_p7 = scmp.lt.s32.totalorder %s423_s27, %s423_s27 }
  0x12   :  { %p430_p8 = por %p429_p7, %p428_p6 }
  0x14   :  { %p431_p9 = pnand %p430_p8, %p424_p5 }
  0x16   :  { %434 = shalt.err (!%p431_p9)
}
  0x17   :  { %39 = dma.hbm_to_vmem [thread:$0]  %s502_s3, 1024, %s34_s26, [#allocation5], %s440_s21, %s440_s21, %s441_s22  }
  0x18   :  { %435 = dma.done.wait [#allocation3], 1024  }
  0x19   :  { %436 = vsyncadd [#allocation3], 4294966272 }
  0x1a   :  { %437 = dma.done.wait [#allocation5], 1024  }
  0x1b   :  { %438 = vsyncadd [#allocation5], 4294966272  ;;  %v443_v0 = vmov 0.0   ;;  %vm444_vm0 = vmmov 0   ;;  %v379_v1 = vld [vmem:[#allocation2 + $0x38] sm:$0xff]   ;;  %v380_v2 = vld [vmem:[#allocation2 + $0x30] sm:$0xff]  }
  0x1c   :  { %333 = vmatprep.subr.bf16.mxu0 %v443_v0  ;;  %349 = vmatprep.mubr.msk.bf16.mxu0 %vm444_vm0, %v443_v0  ;;  %v381_v3 = vld [vmem:[#allocation2 + $0x28] sm:$0xff]   ;;  %v387_v4 = vld [vmem:[#allocation4 + $0x38] sm:$0xff]   ;;  %v382_v5 = vld [vmem:[#allocation2 + $0x20] sm:$0xff]  }
  0x1d   :  { %353 = vmatprep.subr.bf16.mxu1 %v443_v0  ;;  %369 = vmatprep.mubr.msk.bf16.mxu1 %vm444_vm0, %v443_v0  ;;  %v388_v6 = vld [vmem:[#allocation4 + $0x30] sm:$0xff]   ;;  %v383_v7 = vld [vmem:[#allocation2 + $0x18] sm:$0xff]   ;;  %v389_v8 = vld [vmem:[#allocation4 + $0x28] sm:$0xff]  }
  0x1e   :  { %334 = vmatpush3.bf16.msra.mxu0 %v379_v1  ;;  %354 = vmatpush3.bf16.msra.mxu1 %v387_v4  ;;  %v384_v9 = vld [vmem:[#allocation2 + $0x10] sm:$0xff]   ;;  %v390_v10 = vld [vmem:[#allocation4 + $0x20] sm:$0xff]   ;;  %v385_v11 = vld [vmem:[#allocation2 + $0x8] sm:$0xff]  }
  0x1f   :  { %335 = vmatprep.subr.bf16.mxu0 %v443_v0  ;;  %355 = vmatprep.subr.bf16.mxu1 %v443_v0  ;;  %v391_v12 = vld [vmem:[#allocation4 + $0x18] sm:$0xff]   ;;  %v386_v13 = vld [vmem:[#allocation2] sm:$0xff]   ;;  %v63_v15 = vld [vmem:[%s499_s0 + $0x8] sm:$0xff] }
  0x20   :  { %v62_v14 = vld [vmem:[%s499_s0] sm:$0xff]  ;;  %v392_v17 = vld [vmem:[#allocation4 + $0x10] sm:$0xff]   ;;  %v393_v18 = vld [vmem:[#allocation4 + $0x8] sm:$0xff]  }
  0x21   :  { %v64_v16 = vpack.c.bf16 %v63_v15, %v62_v14  ;;  %v394_v19 = vld [vmem:[#allocation4] sm:$0xff]  }
  0x22   :  { %336 = vmatpush3.bf16.msra.mxu0 %v380_v2  ;;  %356 = vmatpush3.bf16.msra.mxu1 %v388_v6  ;;  %v298_v20 = vld [vmem:[%s501_s2] ss:$0 sm:$0xff] }
  0x23   :  { %337 = vmatprep.subr.bf16.mxu0 %v443_v0  ;;  %357 = vmatprep.subr.bf16.mxu1 %v443_v0  ;;  %v297_v30 = vld [vmem:[%s503_s4] ss:$0 sm:$0xff] }
  0x26   :  { %338 = vmatpush3.bf16.msra.mxu0 %v381_v3  ;;  %358 = vmatpush3.bf16.msra.mxu1 %v389_v8 }
  0x27   :  { %339 = vmatprep.subr.bf16.mxu0 %v443_v0  ;;  %359 = vmatprep.subr.bf16.mxu1 %v443_v0 }
  0x2a   :  { %340 = vmatpush3.bf16.msra.mxu0 %v382_v5  ;;  %360 = vmatpush3.bf16.msra.mxu1 %v390_v10 }
  0x2b   :  { %341 = vmatprep.subr.bf16.mxu0 %v443_v0  ;;  %361 = vmatprep.subr.bf16.mxu1 %v443_v0 }
  0x2e   :  { %342 = vmatpush3.bf16.msra.mxu0 %v383_v7  ;;  %362 = vmatpush3.bf16.msra.mxu1 %v391_v12 }
  0x2f   :  { %343 = vmatprep.subr.bf16.mxu0 %v443_v0  ;;  %363 = vmatprep.subr.bf16.mxu1 %v443_v0 }
  0x32   :  { %344 = vmatpush3.bf16.msra.mxu0 %v384_v9  ;;  %364 = vmatpush3.bf16.msra.mxu1 %v392_v17 }
  0x33   :  { %345 = vmatprep.subr.bf16.mxu0 %v443_v0  ;;  %365 = vmatprep.subr.bf16.mxu1 %v443_v0 }
  0x36   :  { %346 = vmatpush3.bf16.msra.mxu0 %v385_v11  ;;  %366 = vmatpush3.bf16.msra.mxu1 %v393_v18 }
  0x37   :  { %347 = vmatprep.subr.bf16.mxu0 %v443_v0  ;;  %367 = vmatprep.subr.bf16.mxu1 %v443_v0 }
  0x3a   :  { %348 = vmatpush3.bf16.msra.mxu0 %v386_v13  ;;  %368 = vmatpush3.bf16.msra.mxu1 %v394_v19 }
  0x3d   :  { %350 = vmatmul.mubr.bf16.vlgmr.msra.gmra.mxu0 %v64_v16 }
  0xfd   :  { %v170_v21 = vpop.f32.mrf.mxu0 }
  0xfe   :  { %v171_v23 = vadd.f32 %v298_v20, %v170_v21 }
  0xff   :  { %v351_v22 = vpop.f32.mrf.mxu0 }
 0x100   :  { %v177_v27 = vmax.f32 %v171_v23, 0.0 }
 0x101   :  { %v173_v24 = vpop.f32.mrf.mxu0 }
 0x102   :  { %v174_v25 = vadd.f32 %v298_v20, %v173_v24 }
 0x103   :  { %v352_v26 = vpop.f32.mrf.mxu0 }
 0x104   :  { %v178_v28 = vmax.f32 %v174_v25, 0.0 }
 0x106   :  { %v181_v29 = vpack.c.bf16 %v178_v28, %v177_v27 }
 0x108   :  { %370 = vmatmul.mubr.bf16.vlgmr.msra.gmra.mxu1 %v181_v29 }
 0x1c8   :  { %v280_v31 = vpop.f32.mrf.mxu1 }
 0x1c9   :  { %v287_v32 = vadd.f32 %v297_v30, %v280_v31 }
 0x1ca   :  { %v371_v33 = vpop.f32.mrf.mxu1 }
 0x1cb   :  { %289 = vst [vmem:[%s504_s5] sm:$0xff] %v287_v32 }
 0x1cc   :  { %v283_v34 = vpop.f32.mrf.mxu1 }
 0x1cd   :  { %v288_v35 = vadd.f32 %v297_v30, %v283_v34 }
 0x1ce   :  { %v372_v36 = vpop.f32.mrf.mxu1 }
 0x1cf   :  { %290 = vst [vmem:[%s504_s5 + $0x8] sm:$0xff] %v288_v35 }
 0x1d0   :  { %295 = vsyncpa [#allocation3], 1 }
 0x1d1   :  { %296 = vsyncpa [#allocation5], 1 }

</bundles_post_ra>
